<compile_context>
chip_gen: v7x
topology: tpu7x:2x2x1
jax: 0.10.0
libtpu: 0.0.40
codegen_flags: <defaults>
</compile_context>

<pallas_src>
import jax
import jax.numpy as jnp
from jax.experimental import pallas as pl
from jax.experimental.pallas import tpu as pltpu


# ---------------------------------------------------------------------------
# Parameter setup (plain JAX glue) — mirrors precompute_freqs_cis
# ---------------------------------------------------------------------------
def precompute_freqs(dim: int, seq_len: int, theta: float):
    freqs = 1.0 / theta ** (jnp.arange(0, dim, 2)[: dim // 2].astype(jnp.float32) / dim)
    t = jnp.arange(seq_len, dtype=jnp.float32)
    angles = jnp.outer(t, freqs)              # (L, dim//2)
    return jnp.cos(angles), jnp.sin(angles)   # real/imag parts of freqs_cis


def build_tables(dim: int, seq_len: int, thetas, dtype=jnp.float32):
    """Returns one packed table of shape (2, 5, L, dim) plus complex freqs for ref.

    tab[0, s, l, 2k]   = tab[0, s, l, 2k+1] =  cos(angle_s[l, k])
    tab[1, s, l, 2k]   = -sin(angle_s[l, k])
    tab[1, s, l, 2k+1] = +sin(angle_s[l, k])     (sign folded in)
    """
    assert dim % 2 == 0, "RoPE head dim must be even"
    sign = jnp.where(jnp.arange(dim) % 2 == 0, -1.0, 1.0).astype(jnp.float32)
    cos_tabs, sin_tabs, freqs_cis = [], [], []
    for th in thetas:
        cos, sin = precompute_freqs(dim, seq_len, th)
        cos_tabs.append(jnp.repeat(cos, 2, axis=-1))
        sin_tabs.append(jnp.repeat(sin, 2, axis=-1) * sign)
        freqs_cis.append(cos + 1j * sin)
    tab = jnp.stack([jnp.stack(cos_tabs), jnp.stack(sin_tabs)]).astype(dtype)  # (2,5,L,D)
    return tab, freqs_cis


# ---------------------------------------------------------------------------
# Pallas kernels
# ---------------------------------------------------------------------------
def _rotate_streams(pos_ref, scale_ref, ori_ref, tab_ref, write):
    # pos_ref/scale_ref: (1, 2, TL, D)   ori_ref: (1, TL, D)   tab_ref: (2, 5, TL, D)
    TL, D = ori_ref.shape[1], ori_ref.shape[2]

    # Hoisted parity mask (lane index even/odd).
    parity = jax.lax.broadcasted_iota(jnp.int32, (TL, D), 1) % 2
    is_even = parity == 0

    streams = (pos_ref[0, 0], pos_ref[0, 1],
               scale_ref[0, 0], scale_ref[0, 1],
               ori_ref[0])
    for s, v in enumerate(streams):                      # static unroll over 5 streams
        cos = tab_ref[0, s]                              # (TL, D)
        sin = tab_ref[1, s]                              # (TL, D), sign folded in
        # Pair-swap via non-negative circular rolls on the lane axis (XLU).
        v_next = pltpu.roll(v, shift=D - 1, axis=1)      # v_next[..., i] = v[..., (i+1) % D]
        v_prev = pltpu.roll(v, shift=1, axis=1)          # v_prev[..., i] = v[..., (i-1) % D]
        v_swap = jnp.where(is_even, v_next, v_prev)
        write(s, v * cos + v_swap * sin)


def rope_kernel_flat(pos_ref, scale_ref, ori_ref, tab_ref, out_ref):
    # out_ref: (1, TL, 5*D) — lane-aligned unmasked slab stores (requires D % 128 == 0)
    D = ori_ref.shape[2]

    def write(s, rot):
        out_ref[0, :, s * D:(s + 1) * D] = rot.astype(out_ref.dtype)

    _rotate_streams(pos_ref, scale_ref, ori_ref, tab_ref, write)


def rope_kernel_stacked(pos_ref, scale_ref, ori_ref, tab_ref, out_ref):
    # out_ref: (1, 5, TL, D) — used when D % 128 != 0 to avoid lane-straddling masked stores
    def write(s, rot):
        out_ref[0, s] = rot.astype(out_ref.dtype)

    _rotate_streams(pos_ref, scale_ref, ori_ref, tab_ref, write)


# ---------------------------------------------------------------------------
# Wrapper
# ---------------------------------------------------------------------------
def _tile_config(max_rows_per_tile=None):
    """Generation-aware L-tile cap and VMEM limit (conservative fallback)."""
    tl_cap, vmem_limit = 512, 48 * 1024 * 1024          # safe for v7x (64 MiB physical)
    try:
        if pltpu.get_tpu_info().vmem_capacity_bytes >= 100 * 1024 * 1024:
            tl_cap, vmem_limit = 1024, 64 * 1024 * 1024  # v5e / v6e (128 MiB)
    except Exception:
        pass
    if max_rows_per_tile is not None:
        tl_cap = max_rows_per_tile
    return tl_cap, vmem_limit


def laf_rope_pallas(position, scale, orientation, tab, *, max_rows_per_tile=None):
    B, two, L, D = position.shape
    assert two == 2
    assert D % 2 == 0, "RoPE head dim must be even"
    assert scale.shape == (B, 2, L, D)
    assert orientation.shape == (B, L, D)
    assert tab.shape == (2, 5, L, D)

    tl_cap, vmem_limit = _tile_config(max_rows_per_tile)
    TL = L if L <= tl_cap else max(8, (tl_cap // 8) * 8)
    nl = pl.cdiv(L, TL)                                  # partial last block allowed

    itemsize = jnp.dtype(position.dtype).itemsize
    cost = pl.CostEstimate(
        flops=4 * 5 * B * L * D,
        transcendentals=0,
        bytes_accessed=(10 * B * L * D + 10 * L * D) * itemsize,
    )

    # Three separate stream inputs (no wrapper concat) + one packed table whose
    # block index depends only on the L tile -> resident across the inner B axis.
    in_specs = [
        pl.BlockSpec((1, 2, TL, D), lambda l, b: (b, 0, l, 0)),   # position
        pl.BlockSpec((1, 2, TL, D), lambda l, b: (b, 0, l, 0)),   # scale
        pl.BlockSpec((1, TL, D), lambda l, b: (b, l, 0)),         # orientation
        pl.BlockSpec((2, 5, TL, D), lambda l, b: (0, 0, l, 0)),   # packed cos/sin table
    ]
    cparams = pltpu.CompilerParams(
        dimension_semantics=("parallel", "parallel"),
        vmem_limit_bytes=vmem_limit,
    )

    if D % 128 == 0:
        # Lane-dense flat output: unmasked per-stream slab stores.
        return pl.pallas_call(
            rope_kernel_flat,
            out_shape=jax.ShapeDtypeStruct((B, L, 5 * D), position.dtype),
            grid=(nl, B),
            in_specs=in_specs,
            out_specs=pl.BlockSpec((1, TL, 5 * D), lambda l, b: (b, l, 0)),
            compiler_params=cparams,
            cost_estimate=cost,
        )(position, scale, orientation, tab)

    # Small-D path: stacked kernel output, reshaped to (B, L, 5*D) in the wrapper.
    stacked = pl.pallas_call(
        rope_kernel_stacked,
        out_shape=jax.ShapeDtypeStruct((B, 5, L, D), position.dtype),
        grid=(nl, B),
        in_specs=in_specs,
        out_specs=pl.BlockSpec((1, 5, TL, D), lambda l, b: (b, 0, l, 0)),
        compiler_params=cparams,
        cost_estimate=cost,
    )(position, scale, orientation, tab)
    return jnp.transpose(stacked, (0, 2, 1, 3)).reshape(B, L, 5 * D)


# ---------------------------------------------------------------------------
# Pure-JAX reference (complex math, mirrors the intended torch forward)
# ---------------------------------------------------------------------------
def rope_ref(position, scale, orientation, freqs_cis):
    def rot(v, fc):
        vc = v[..., 0::2] + 1j * v[..., 1::2]            # view_as_complex
        oc = vc * fc                                     # (B, L, D//2) * (L, D//2)
        out = jnp.stack([oc.real, oc.imag], axis=-1)     # view_as_real
        return out.reshape(v.shape).astype(v.dtype)      # flatten(2)

    x = rot(position[:, 0], freqs_cis[0])
    y = rot(position[:, 1], freqs_cis[1])
    sx = rot(scale[:, 0], freqs_cis[2])
    sy = rot(scale[:, 1], freqs_cis[3])
    ox = rot(orientation, freqs_cis[4])
    return jnp.concatenate([x, y, sx, sy, ox], axis=-1)


if __name__ == "__main__":
    thetas = [10000.0, 5000.0, 10000.0, 2000.0, 10000.0]
    key = jax.random.PRNGKey(0)

    def run_case(B, L, D):
        k1, k2, k3 = jax.random.split(jax.random.fold_in(key, D), 3)
        position = jax.random.normal(k1, (B, 2, L, D), dtype=jnp.float32)
        scale = jax.random.normal(k2, (B, 2, L, D), dtype=jnp.float32)
        orientation = jax.random.normal(k3, (B, L, D), dtype=jnp.float32)
        tab, freqs_cis = build_tables(D, L, thetas, dtype=jnp.float32)

        out = jax.block_until_ready(laf_rope_pallas(position, scale, orientation, tab))
        ref = rope_ref(position, scale, orientation, freqs_cis)
        assert out.shape == (B, L, 5 * D)
        assert jnp.allclose(out, ref, atol=1e-5, rtol=1e-5), f"mismatch vs reference (D={D})"

    run_case(2, 8, 256)   # module's dim=256 -> lane-dense flat output path
    run_case(2, 8, 32)    # small-D path -> stacked output + wrapper reshape
    print("KERNEL_OK")
</pallas_src>

<mosaic_0001>
module attributes {stable_mosaic.version = 11 : i64} {
  func.func @rope_kernel_flat(%arg0: i32, %arg1: i32, %arg2: memref<1x2x8x256xf32, #tpu.memory_space<vmem>>, %arg3: memref<1x2x8x256xf32, #tpu.memory_space<vmem>>, %arg4: memref<1x8x256xf32, #tpu.memory_space<vmem>>, %arg5: memref<2x5x8x256xf32, #tpu.memory_space<vmem>>, %arg6: memref<1x8x1280xf32, #tpu.memory_space<vmem>>) attributes {dimension_semantics = [#tpu.dimension_semantics<parallel>, #tpu.dimension_semantics<parallel>], iteration_bounds = array<i64: 1, 2>, scalar_prefetch = 0 : i64, scratch_operands = 0 : i64, tpu.core_type = #tpu.core_type<tc>, window_params = [{transform_indices = @transform_0, window_bounds = array<i64: 1, 2, 8, 256>}, {transform_indices = @transform_1, window_bounds = array<i64: 1, 2, 8, 256>}, {transform_indices = @transform_2, window_bounds = array<i64: 1, 8, 256>}, {transform_indices = @transform_3, window_bounds = array<i64: 2, 5, 8, 256>}, {transform_indices = @transform_4, window_bounds = array<i64: 1, 8, 1280>}]} {
    %0 = tpu.iota {dimensions = array<i32: 1>} : vector<8x256xi32>
    %c2_i32 = arith.constant 2 : i32
    %c0_i32 = arith.constant 0 : i32
    %1 = arith.cmpi eq, %c2_i32, %c0_i32 : i32
    %c1_i32 = arith.constant 1 : i32
    %2 = arith.select %1, %c1_i32, %c2_i32 : i32
    %3 = vector.broadcast %2 : i32 to vector<8x256xi32>
    %4 = arith.remsi %0, %3 : vector<8x256xi32>
    %c0_i32_0 = arith.constant 0 : i32
    %5 = vector.broadcast %c0_i32_0 : i32 to vector<8x256xi32>
    %6 = arith.cmpi ne, %4, %5 : vector<8x256xi32>
    %c0_i32_1 = arith.constant 0 : i32
    %7 = vector.broadcast %c0_i32_1 : i32 to vector<8x256xi32>
    %8 = arith.cmpi slt, %4, %7 : vector<8x256xi32>
    %c0_i32_2 = arith.constant 0 : i32
    %9 = arith.cmpi slt, %2, %c0_i32_2 : i32
    %10 = vector.broadcast %9 : i1 to vector<8x256xi1>
    %11 = vector.broadcast %10 : vector<8x256xi1> to vector<8x256xi1>
    %12 = arith.xori %8, %11 : vector<8x256xi1>
    %13 = arith.andi %12, %6 : vector<8x256xi1>
    %14 = vector.broadcast %2 : i32 to vector<8x256xi32>
    %15 = arith.addi %4, %14 : vector<8x256xi32>
    %16 = arith.select %13, %15, %4 : vector<8x256xi1>, vector<8x256xi32>
    %c0_i32_3 = arith.constant 0 : i32
    %17 = vector.broadcast %c0_i32_3 : i32 to vector<8x256xi32>
    %18 = arith.cmpi eq, %16, %17 : vector<8x256xi32>
    %c0 = arith.constant 0 : index
    %c0_4 = arith.constant 0 : index
    %c0_5 = arith.constant 0 : index
    %c0_6 = arith.constant 0 : index
    %19 = vector.load %arg2[%c0, %c0_4, %c0_5, %c0_6] : memref<1x2x8x256xf32, #tpu.memory_space<vmem>>, vector<1x1x8x256xf32>
    %20 = vector.shape_cast %19 : vector<1x1x8x256xf32> to vector<8x256xf32>
    %c0_7 = arith.constant 0 : index
    %c1 = arith.constant 1 : index
    %c0_8 = arith.constant 0 : index
    %c0_9 = arith.constant 0 : index
    %21 = vector.load %arg2[%c0_7, %c1, %c0_8, %c0_9] : memref<1x2x8x256xf32, #tpu.memory_space<vmem>>, vector<1x1x8x256xf32>
    %22 = vector.shape_cast %21 : vector<1x1x8x256xf32> to vector<8x256xf32>
    %c0_10 = arith.constant 0 : index
    %c0_11 = arith.constant 0 : index
    %c0_12 = arith.constant 0 : index
    %c0_13 = arith.constant 0 : index
    %23 = vector.load %arg3[%c0_10, %c0_11, %c0_12, %c0_13] : memref<1x2x8x256xf32, #tpu.memory_space<vmem>>, vector<1x1x8x256xf32>
    %24 = vector.shape_cast %23 : vector<1x1x8x256xf32> to vector<8x256xf32>
    %c0_14 = arith.constant 0 : index
    %c1_15 = arith.constant 1 : index
    %c0_16 = arith.constant 0 : index
    %c0_17 = arith.constant 0 : index
    %25 = vector.load %arg3[%c0_14, %c1_15, %c0_16, %c0_17] : memref<1x2x8x256xf32, #tpu.memory_space<vmem>>, vector<1x1x8x256xf32>
    %26 = vector.shape_cast %25 : vector<1x1x8x256xf32> to vector<8x256xf32>
    %c0_18 = arith.constant 0 : index
    %c0_19 = arith.constant 0 : index
    %c0_20 = arith.constant 0 : index
    %27 = vector.load %arg4[%c0_18, %c0_19, %c0_20] : memref<1x8x256xf32, #tpu.memory_space<vmem>>, vector<1x8x256xf32>
    %28 = vector.shape_cast %27 : vector<1x8x256xf32> to vector<8x256xf32>
    %c0_21 = arith.constant 0 : index
    %c0_22 = arith.constant 0 : index
    %c0_23 = arith.constant 0 : index
    %c0_24 = arith.constant 0 : index
    %29 = vector.load %arg5[%c0_21, %c0_22, %c0_23, %c0_24] : memref<2x5x8x256xf32, #tpu.memory_space<vmem>>, vector<1x1x8x256xf32>
    %30 = vector.shape_cast %29 : vector<1x1x8x256xf32> to vector<8x256xf32>
    %c1_25 = arith.constant 1 : index
    %c0_26 = arith.constant 0 : index
    %c0_27 = arith.constant 0 : index
    %c0_28 = arith.constant 0 : index
    %31 = vector.load %arg5[%c1_25, %c0_26, %c0_27, %c0_28] : memref<2x5x8x256xf32, #tpu.memory_space<vmem>>, vector<1x1x8x256xf32>
    %32 = vector.shape_cast %31 : vector<1x1x8x256xf32> to vector<8x256xf32>
    %c255_i32 = arith.constant 255 : i32
    %33 = tpu.dynamic_rotate %20 by %c255_i32 dim 1 : vector<8x256xf32>, i32 -> vector<8x256xf32>
    %c1_i32_29 = arith.constant 1 : i32
    %34 = tpu.dynamic_rotate %20 by %c1_i32_29 dim 1 : vector<8x256xf32>, i32 -> vector<8x256xf32>
    %35 = arith.select %18, %33, %34 : vector<8x256xi1>, vector<8x256xf32>
    %36 = arith.mulf %20, %30 : vector<8x256xf32>
    %37 = arith.mulf %35, %32 : vector<8x256xf32>
    %38 = arith.addf %36, %37 : vector<8x256xf32>
    %c0_30 = arith.constant 0 : index
    %c0_31 = arith.constant 0 : index
    %c0_32 = arith.constant 0 : index
    %39 = vector.load %arg6[%c0_30, %c0_31, %c0_32] : memref<1x8x1280xf32, #tpu.memory_space<vmem>>, vector<1x8x256xf32>
    %40 = vector.shape_cast %39 : vector<1x8x256xf32> to vector<8x256xf32>
    %41 = vector.shape_cast %38 : vector<8x256xf32> to vector<1x8x256xf32>
    tpu.vector_store %arg6[%c0_30, %c0_31, %c0_32], %41 {strides = array<i32>} : memref<1x8x1280xf32, #tpu.memory_space<vmem>>, vector<1x8x256xf32>,
    %c0_33 = arith.constant 0 : index
    %c1_34 = arith.constant 1 : index
    %c0_35 = arith.constant 0 : index
    %c0_36 = arith.constant 0 : index
    %42 = vector.load %arg5[%c0_33, %c1_34, %c0_35, %c0_36] : memref<2x5x8x256xf32, #tpu.memory_space<vmem>>, vector<1x1x8x256xf32>
    %43 = vector.shape_cast %42 : vector<1x1x8x256xf32> to vector<8x256xf32>
    %c1_37 = arith.constant 1 : index
    %c1_38 = arith.constant 1 : index
    %c0_39 = arith.constant 0 : index
    %c0_40 = arith.constant 0 : index
    %44 = vector.load %arg5[%c1_37, %c1_38, %c0_39, %c0_40] : memref<2x5x8x256xf32, #tpu.memory_space<vmem>>, vector<1x1x8x256xf32>
    %45 = vector.shape_cast %44 : vector<1x1x8x256xf32> to vector<8x256xf32>
    %c255_i32_41 = arith.constant 255 : i32
    %46 = tpu.dynamic_rotate %22 by %c255_i32_41 dim 1 : vector<8x256xf32>, i32 -> vector<8x256xf32>
    %c1_i32_42 = arith.constant 1 : i32
    %47 = tpu.dynamic_rotate %22 by %c1_i32_42 dim 1 : vector<8x256xf32>, i32 -> vector<8x256xf32>
    %48 = arith.select %18, %46, %47 : vector<8x256xi1>, vector<8x256xf32>
    %49 = arith.mulf %22, %43 : vector<8x256xf32>
    %50 = arith.mulf %48, %45 : vector<8x256xf32>
    %51 = arith.addf %49, %50 : vector<8x256xf32>
    %c0_43 = arith.constant 0 : index
    %c0_44 = arith.constant 0 : index
    %c256 = arith.constant 256 : index
    %52 = vector.load %arg6[%c0_43, %c0_44, %c256] : memref<1x8x1280xf32, #tpu.memory_space<vmem>>, vector<1x8x256xf32>
    %53 = vector.shape_cast %52 : vector<1x8x256xf32> to vector<8x256xf32>
    %54 = vector.shape_cast %51 : vector<8x256xf32> to vector<1x8x256xf32>
    tpu.vector_store %arg6[%c0_43, %c0_44, %c256], %54 {strides = array<i32>} : memref<1x8x1280xf32, #tpu.memory_space<vmem>>, vector<1x8x256xf32>,
    %c0_45 = arith.constant 0 : index
    %c2 = arith.constant 2 : index
    %c0_46 = arith.constant 0 : index
    %c0_47 = arith.constant 0 : index
    %55 = vector.load %arg5[%c0_45, %c2, %c0_46, %c0_47] : memref<2x5x8x256xf32, #tpu.memory_space<vmem>>, vector<1x1x8x256xf32>
    %56 = vector.shape_cast %55 : vector<1x1x8x256xf32> to vector<8x256xf32>
    %c1_48 = arith.constant 1 : index
    %c2_49 = arith.constant 2 : index
    %c0_50 = arith.constant 0 : index
    %c0_51 = arith.constant 0 : index
    %57 = vector.load %arg5[%c1_48, %c2_49, %c0_50, %c0_51] : memref<2x5x8x256xf32, #tpu.memory_space<vmem>>, vector<1x1x8x256xf32>
    %58 = vector.shape_cast %57 : vector<1x1x8x256xf32> to vector<8x256xf32>
    %c255_i32_52 = arith.constant 255 : i32
    %59 = tpu.dynamic_rotate %24 by %c255_i32_52 dim 1 : vector<8x256xf32>, i32 -> vector<8x256xf32>
    %c1_i32_53 = arith.constant 1 : i32
    %60 = tpu.dynamic_rotate %24 by %c1_i32_53 dim 1 : vector<8x256xf32>, i32 -> vector<8x256xf32>
    %61 = arith.select %18, %59, %60 : vector<8x256xi1>, vector<8x256xf32>
    %62 = arith.mulf %24, %56 : vector<8x256xf32>
    %63 = arith.mulf %61, %58 : vector<8x256xf32>
    %64 = arith.addf %62, %63 : vector<8x256xf32>
    %c0_54 = arith.constant 0 : index
    %c0_55 = arith.constant 0 : index
    %c512 = arith.constant 512 : index
    %65 = vector.load %arg6[%c0_54, %c0_55, %c512] : memref<1x8x1280xf32, #tpu.memory_space<vmem>>, vector<1x8x256xf32>
    %66 = vector.shape_cast %65 : vector<1x8x256xf32> to vector<8x256xf32>
    %67 = vector.shape_cast %64 : vector<8x256xf32> to vector<1x8x256xf32>
    tpu.vector_store %arg6[%c0_54, %c0_55, %c512], %67 {strides = array<i32>} : memref<1x8x1280xf32, #tpu.memory_space<vmem>>, vector<1x8x256xf32>,
    %c0_56 = arith.constant 0 : index
    %c3 = arith.constant 3 : index
    %c0_57 = arith.constant 0 : index
    %c0_58 = arith.constant 0 : index
    %68 = vector.load %arg5[%c0_56, %c3, %c0_57, %c0_58] : memref<2x5x8x256xf32, #tpu.memory_space<vmem>>, vector<1x1x8x256xf32>
    %69 = vector.shape_cast %68 : vector<1x1x8x256xf32> to vector<8x256xf32>
    %c1_59 = arith.constant 1 : index
    %c3_60 = arith.constant 3 : index
    %c0_61 = arith.constant 0 : index
    %c0_62 = arith.constant 0 : index
    %70 = vector.load %arg5[%c1_59, %c3_60, %c0_61, %c0_62] : memref<2x5x8x256xf32, #tpu.memory_space<vmem>>, vector<1x1x8x256xf32>
    %71 = vector.shape_cast %70 : vector<1x1x8x256xf32> to vector<8x256xf32>
    %c255_i32_63 = arith.constant 255 : i32
    %72 = tpu.dynamic_rotate %26 by %c255_i32_63 dim 1 : vector<8x256xf32>, i32 -> vector<8x256xf32>
    %c1_i32_64 = arith.constant 1 : i32
    %73 = tpu.dynamic_rotate %26 by %c1_i32_64 dim 1 : vector<8x256xf32>, i32 -> vector<8x256xf32>
    %74 = arith.select %18, %72, %73 : vector<8x256xi1>, vector<8x256xf32>
    %75 = arith.mulf %26, %69 : vector<8x256xf32>
    %76 = arith.mulf %74, %71 : vector<8x256xf32>
    %77 = arith.addf %75, %76 : vector<8x256xf32>
    %c0_65 = arith.constant 0 : index
    %c0_66 = arith.constant 0 : index
    %c768 = arith.constant 768 : index
    %78 = vector.load %arg6[%c0_65, %c0_66, %c768] : memref<1x8x1280xf32, #tpu.memory_space<vmem>>, vector<1x8x256xf32>
    %79 = vector.shape_cast %78 : vector<1x8x256xf32> to vector<8x256xf32>
    %80 = vector.shape_cast %77 : vector<8x256xf32> to vector<1x8x256xf32>
    tpu.vector_store %arg6[%c0_65, %c0_66, %c768], %80 {strides = array<i32>} : memref<1x8x1280xf32, #tpu.memory_space<vmem>>, vector<1x8x256xf32>,
    %c0_67 = arith.constant 0 : index
    %c4 = arith.constant 4 : index
    %c0_68 = arith.constant 0 : index
    %c0_69 = arith.constant 0 : index
    %81 = vector.load %arg5[%c0_67, %c4, %c0_68, %c0_69] : memref<2x5x8x256xf32, #tpu.memory_space<vmem>>, vector<1x1x8x256xf32>
    %82 = vector.shape_cast %81 : vector<1x1x8x256xf32> to vector<8x256xf32>
    %c1_70 = arith.constant 1 : index
    %c4_71 = arith.constant 4 : index
    %c0_72 = arith.constant 0 : index
    %c0_73 = arith.constant 0 : index
    %83 = vector.load %arg5[%c1_70, %c4_71, %c0_72, %c0_73] : memref<2x5x8x256xf32, #tpu.memory_space<vmem>>, vector<1x1x8x256xf32>
    %84 = vector.shape_cast %83 : vector<1x1x8x256xf32> to vector<8x256xf32>
    %c255_i32_74 = arith.constant 255 : i32
    %85 = tpu.dynamic_rotate %28 by %c255_i32_74 dim 1 : vector<8x256xf32>, i32 -> vector<8x256xf32>
    %c1_i32_75 = arith.constant 1 : i32
    %86 = tpu.dynamic_rotate %28 by %c1_i32_75 dim 1 : vector<8x256xf32>, i32 -> vector<8x256xf32>
    %87 = arith.select %18, %85, %86 : vector<8x256xi1>, vector<8x256xf32>
    %88 = arith.mulf %28, %82 : vector<8x256xf32>
    %89 = arith.mulf %87, %84 : vector<8x256xf32>
    %90 = arith.addf %88, %89 : vector<8x256xf32>
    %c0_76 = arith.constant 0 : index
    %c0_77 = arith.constant 0 : index
    %c1024 = arith.constant 1024 : index
    %91 = vector.load %arg6[%c0_76, %c0_77, %c1024] : memref<1x8x1280xf32, #tpu.memory_space<vmem>>, vector<1x8x256xf32>
    %92 = vector.shape_cast %91 : vector<1x8x256xf32> to vector<8x256xf32>
    %93 = vector.shape_cast %90 : vector<8x256xf32> to vector<1x8x256xf32>
    tpu.vector_store %arg6[%c0_76, %c0_77, %c1024], %93 {strides = array<i32>} : memref<1x8x1280xf32, #tpu.memory_space<vmem>>, vector<1x8x256xf32>,
    return
  }
  func.func @transform_0(%arg0: i32, %arg1: i32) -> (i32, i32, i32, i32) {
    %c0_i32 = arith.constant 0 : i32
    %c0_i32_0 = arith.constant 0 : i32
    %c0_i32_1 = arith.constant 0 : i32
    return %arg1, %c0_i32, %arg0, %c0_i32_0 : i32, i32, i32, i32
  }
  func.func @transform_1(%arg0: i32, %arg1: i32) -> (i32, i32, i32, i32) {
    %c0_i32 = arith.constant 0 : i32
    %c0_i32_0 = arith.constant 0 : i32
    %c0_i32_1 = arith.constant 0 : i32
    return %arg1, %c0_i32, %arg0, %c0_i32_0 : i32, i32, i32, i32
  }
  func.func @transform_2(%arg0: i32, %arg1: i32) -> (i32, i32, i32) {
    %c0_i32 = arith.constant 0 : i32
    %c0_i32_0 = arith.constant 0 : i32
    return %arg1, %arg0, %c0_i32 : i32, i32, i32
  }
  func.func @transform_3(%arg0: i32, %arg1: i32) -> (i32, i32, i32, i32) {
    %c0_i32 = arith.constant 0 : i32
    %c0_i32_0 = arith.constant 0 : i32
    %c0_i32_1 = arith.constant 0 : i32
    %c0_i32_2 = arith.constant 0 : i32
    return %c0_i32, %c0_i32_0, %arg0, %c0_i32_1 : i32, i32, i32, i32
  }
  func.func @transform_4(%arg0: i32, %arg1: i32) -> (i32, i32, i32) {
    %c0_i32 = arith.constant 0 : i32
    %c0_i32_0 = arith.constant 0 : i32
    return %arg1, %arg0, %c0_i32 : i32, i32, i32
  }
}

</mosaic_0001>

<bundles_post_ra>
// kernel: tpu_custom_call.1
= control target key start
LH: loop header
LB: loop body
LE: loop exit
PB: predicated region body
PF: predicated region fallthrough
CT: control target
= control target key end

     0   :  { %s1467_s0 = inlined_call_operand.hbm [shape: f32[2,2,8,256], index: 0, kind: input, shape index: {}]   ;;  %s1468_s1 = inlined_call_operand.hbm [shape: f32[2,2,8,256], index: 1, kind: input, shape index: {}]   ;;  %s1469_s2 = inlined_call_operand.hbm [shape: f32[2,8,256], index: 2, kind: input, shape index: {}]   ;;  %s1470_s3 = inlined_call_operand.hbm [shape: f32[2,5,8,256], index: 3, kind: input, shape index: {}]   ;;  %s1471_s4 = inlined_call_operand.hbm [shape: f32[2,8,1280], index: 4, kind: output, shape index: {}]  }
   0x1   :  { %1489 = sst [smem:[#allocation19_spill]] %s1467_s0 }
   0x2   :  { %1490 = sst [smem:[#allocation20_spill]] %s1468_s1 }
   0x3   :  { %9 = vsyncpa [#allocation3], 0 }
   0x4   :  { %11 = vsyncpa [#allocation3 + $0x1], 0 }
   0x5   :  { %12 = vsyncpa [#allocation6], 0 }
   0x6   :  { %14 = vsyncpa [#allocation6 + $0x1], 0 }
   0x7   :  { %15 = vsyncpa [#allocation9], 0 }
   0x8   :  { %16 = vsyncpa [#allocation4], 0 }
   0x9   :  { %18 = vsyncpa [#allocation4 + $0x1], 0  ;;  %s1046_s15 = smov 0   ;;  %s1048_s16 = smov 0  }
   0xa   :  { %s1050_s17 = smov 0   ;;  %s1052_s18 = smov 0  }
   0xb   :  { %s1054_s19 = smov 0   ;;  %s1056_s20 = smov 0  }
   0xc LB: > { %1491 = sst [smem:[#allocation15_spill]] %s998_s17  ;;  %s33_s21 = sadd.s32 1, %s1006_s19  ;;  %s1010_s20 = sphi %s1056_s20, %s24_s20   ;;  %s1006_s19 = sphi %s1054_s19, %s1528_s19   ;;  %s1002_s18 = sphi %s1052_s18, %s1527_s18   ;;  %s998_s17 = sphi %s1050_s17, %s1523_s17   ;;  %s994_s16 = sphi %s1048_s16, %s1526_s16   ;;  %s990_s15 = sphi %s1046_s15, %s1525_s15  }
   0xd   : > { %1492 = sst [smem:[#allocation16_spill]] %s1010_s20  ;;  %s45_s22 = sadd.s32 1, %s998_s17 }
   0xe   : > { %p34_p0 = scmp.ge.s32.totalorder %s33_s21, 2  ;;  %p1472_p1 = scmp.ne.s32.totalorder %s998_s17, %s994_s16 }
   0xf   : > { %p53_p2 = scmp.eq.s32.totalorder %s1010_s20, 0  ;;  %p746_p6 = scmp.lt.s32.totalorder %s1010_s20, 2 }
  0x10   : > { %s1530_s21 = smov (%p34_p0, %s33_s21), 0  ;;  %s1091_s24 = sand.u32 1, %s998_s17  }
  0x11   : > { %1493 = sst [smem:[#allocation17_spill]] %s1530_s21  ;;  %p54_p3 = por %p53_p2, %p1472_p1 }
  0x12   : > { %s40_s23 = ssub.s32 %s1006_s19, %s1530_s21  ;;  %s710_s25 = sshll.u32 %s1006_s19, 9 }
  0x13   : > { %p43_p5 = scmp.eq.s32.totalorder %s40_s23, 0  ;;  %s689_s27 = sshll.u32 %s1091_s24, 5 }
  0x14   : > { %p1098_p7 = pnand %p746_p6, %p54_p3  ;;  %s231_s29 = sand.u32 1, %s1010_s20  }
  0x15   : > { %s1095_s26 = scalar_select %p43_p5, %s998_s17, %s45_s22  }
  0x16   : > { %s1495_s28 = scalar_select %p1098_p7, 1, 0 }
  0x17   : > { %1494 = sst [smem:[#allocation18_spill]] %s1095_s26  ;;  %s1496_s1 = sld [smem:[#allocation20_spill]] }
  0x18   : > { %s235_s7 = scalar_lea.vmem [#allocation5], %s689_s27  ;;  %s1114_s9 = scalar_lea.sflag [#allocation6], %s231_s29 }
  0x19   : > { %s244_s8 = sshll.u32 %s235_s7, 4  ;;  %p1120_p9 = pneg %p1098_p7  ;;  %s1112_s8 = int_to_ptr.vmem [resolvable:$true] %s244_s8 }
  0x1b   : > { %s1497_s11 = scalar_select %p1120_p9, 1, 0 }
  0x1d   : > { %s1108_s6 = scalar_lea.hbm %s1496_s1, %s710_s25  ;;  %s807_s14 = scalar_lea.hbm %s1496_s1, 1024 }
  0x1e   : > { %s802_s10 = scalar_lea.hbm %s1108_s6, 512  ;;  %p808_p12 = scmp.lt.u32.totalorder %s1108_s6, %s1496_s1 }
  0x1f   : > { %p803_p8 = scmp.ne.s32.totalorder %s1108_s6, %s802_s10  ;;  %p809_p13 = scmp.lt.u32.totalorder %s807_s14, %s802_s10 }
  0x20   : > { %p811_p2 = scmp.lt.u32.totalorder %s802_s10, %s1108_s6 }
  0x21   : > { %p805_p10 = pnand %p1120_p9, %p803_p8  ;;  %p810_p0 = por %p809_p13, %p808_p12 }
  0x23   : > { %p806_p11 = pneg %p805_p10  ;;  %p812_p3 = por %p811_p2, %p810_p0 }
  0x25   : > { %p813_p5 = pnand %p812_p3, %p806_p11 }
  0x27   : > { %816 = shalt.err (!%p813_p5)
}
  0x28   : > { %s817_s29 = scalar_lea.vmem %s1112_s8, 512  ;;  %s1012_s30 = smov [#allocation5]  }
  0x29   : > { %p818_p6 = scmp.ne.s32.totalorder %s1112_s8, %s817_s29  ;;  %s822_s5 = sshll.u32 %s1012_s30, 4  ;;  %s823_s5 = int_to_ptr.vmem [resolvable:$false] %s822_s5 }
  0x2a   : > { %s824_s7 = scalar_lea.vmem %s823_s5, 1024  ;;  %p825_p4 = scmp.lt.s32.totalorder %s1112_s8, %s823_s5 }
  0x2b   : > { %p820_p8 = pnand %p818_p6, %p1120_p9  ;;  %p826_p1 = scmp.lt.s32.totalorder %s824_s7, %s817_s29 }
  0x2d   : > { %p821_p10 = pneg %p820_p8  ;;  %p827_p12 = por %p826_p1, %p825_p4 }
  0x2f   : > { %p828_p13 = pnand %p827_p12, %p821_p10 }
  0x31   : > { %831 = shalt.err (!%p828_p13)
}
  0x32   : > { %s1473_s10 = smov 256   ;;  %s1475_s12 = smov 16  }
  0x33   : > { %737 = dma.hbm_to_vmem [thread:$0]  (!%p1098_p7), %s1108_s6, 512, %s1112_s8, %s1114_s9, %s1473_s10, %s1473_s10, %s1475_s12  }
  0x34   : > { %s1148_s13 = sadd.s32 4294967295, %s1010_s20   ;;  %s685_s14 = sadd.s32 4294967294, %s1010_s20  }
  0x35   : > { %p58_p1 = scmp.ne.s32.totalorder %s994_s16, %s990_s15  ;;  %p1478_p4 = scmp.eq.s32.totalorder %s1148_s13, 0 }
  0x36   : > { %p166_p11 = scmp.eq.s32.totalorder %s1148_s13, 1  ;;  %p172_p0 = scmp.eq.s32.totalorder %s685_s14, 1 }
  0x37   : > { %p686_p2 = scmp.ge.s32.totalorder %s1010_s20, 1  ;;  %p1158_p3 = por %p1478_p4, %p58_p1 }
  0x38   : > { %p1499_p5 = scmp.ne.s32.totalorder %s998_s17, %s994_s16  ;;  %p1169_p8 = por %p172_p0, %p58_p1 }
  0x39   : > { %s1498_s22 = scalar_select %p1158_p3, 1, 0 }
  0x3a   : > { %p1165_p6 = por %p166_p11, %p1499_p5  ;;  %p179_p10 = scmp.lt.s32.totalorder %s1010_s20, 3 }
  0x3b   : > { %s1501_s8 = scalar_select %p1169_p8, 1, 0 }
  0x3c   : > { %s1500_s6 = scalar_select %p1165_p6, 1, 0 }
  0x3d   : > { %p1174_p12 = pnand %p686_p2, %p179_p10  ;;  %s1015_s29 = smov [#allocation8]  }
  0x3e   : > { %s194_s30 = sshll.u32 %s1015_s29, 4  ;;  %s1503_s0 = sld [smem:[#allocation19_spill]]  ;;  %s1178_s30 = int_to_ptr.vmem [resolvable:$true] %s194_s30 }
  0x3f   : > { %s1502_s23 = scalar_select %p1174_p12, 1, 0 }
  0x40   : > { %p727_p13 = pneg %p1174_p12  ;;  %s212_s10 = scalar_lea.vmem [#allocation2], %s689_s27 }
  0x41   : > { %s221_s12 = sshll.u32 %s212_s10, 4  ;;  %s209_s1 = scalar_lea.sflag [#allocation3], %s1091_s24  ;;  %s1197_s12 = int_to_ptr.vmem [resolvable:$true] %s221_s12 }
  0x42   : > { %p1193_p1 = pnand %p727_p13, %p1478_p4 }
  0x44   : > { %s1187_s14 = scalar_lea.hbm %s1503_s0, %s710_s25  ;;  %s837_s7 = scalar_lea.hbm %s1503_s0, 1024 }
  0x45   : > { %s1504_s29 = scalar_select %p1193_p1, 1, 0 }
  0x46   : > { %s832_s21 = scalar_lea.hbm %s1187_s14, 512  ;;  %p838_p5 = scmp.lt.u32.totalorder %s1187_s14, %s1503_s0 }
  0x47   : > { %p833_p11 = scmp.ne.s32.totalorder %s1187_s14, %s832_s21  ;;  %p839_p10 = scmp.lt.u32.totalorder %s837_s7, %s832_s21 }
  0x48   : > { %p841_p4 = scmp.lt.u32.totalorder %s832_s21, %s1187_s14 }
  0x49   : > { %p835_p0 = pnand %p833_p11, %p1120_p9  ;;  %p840_p13 = por %p839_p10, %p838_p5 }
  0x4b   : > { %p836_p2 = pneg %p835_p0  ;;  %p842_p8 = por %p841_p4, %p840_p13 }
  0x4d   : > { %p843_p6 = pnand %p842_p8, %p836_p2 }
  0x4f   : > { %846 = shalt.err (!%p843_p6)
}
  0x50   : > { %s847_s10 = scalar_lea.vmem %s1197_s12, 512  ;;  %s1016_s25 = smov [#allocation2]  }
  0x51   : > { %p848_p11 = scmp.ne.s32.totalorder %s1197_s12, %s847_s10  ;;  %s852_s5 = sshll.u32 %s1016_s25, 4  ;;  %s853_s5 = int_to_ptr.vmem [resolvable:$false] %s852_s5 }
  0x52   : > { %s854_s26 = scalar_lea.vmem %s853_s5, 1024  ;;  %p855_p12 = scmp.lt.s32.totalorder %s1197_s12, %s853_s5 }
  0x53   : > { %p850_p0 = pnand %p848_p11, %p1120_p9  ;;  %p856_p1 = scmp.lt.s32.totalorder %s854_s26, %s847_s10 }
  0x55   : > { %p851_p3 = pneg %p850_p0  ;;  %p857_p5 = por %p856_p1, %p855_p12 }
  0x57   : > { %p858_p10 = pnand %p857_p5, %p851_p3 }
  0x59   : > { %861 = shalt.err (!%p858_p10)
}
  0x5a   : > { %s1505_s21 = smov 16   ;;  %s1506_s7 = smov 256  }
  0x5b   : > { %734 = dma.hbm_to_vmem [thread:$0]  (!%p1098_p7), %s1187_s14, 512, %s1197_s12, %s209_s1, %s1506_s7, %s1506_s7, %s1505_s21  }
  0x5c   : > { %s695_s27 = sshll.u32 %s1091_s24, 4  ;;  %s862_s10 = scalar_lea.hbm %s1470_s3, 2560 }
  0x5d   : > { %p863_p4 = scmp.ne.s32.totalorder %s1470_s3, %s862_s10  ;;  %p1507_p3 = scmp.ne.s32.totalorder %s1504_s29, 0 }
  0x5e   : > { %p869_p1 = scmp.lt.u32.totalorder %s862_s10, %s1470_s3 }
  0x5f   : > { %p864_p6 = pneg %p1507_p3 }
  0x61   : > { %p865_p8 = pnand %p864_p6, %p863_p4 }
  0x63   : > { %p866_p12 = pneg %p865_p8 }
  0x65   : > { %p871_p2 = pnand %p869_p1, %p866_p12 }
  0x67   : > { %874 = shalt.err (!%p871_p2)
}
  0x68   : > { %s875_s1 = scalar_lea.vmem %s1178_s30, 2560  ;;  %p883_p5 = scmp.lt.s32.totalorder %s1178_s30, %s1178_s30 }
  0x69   : > { %p876_p13 = scmp.ne.s32.totalorder %s1178_s30, %s875_s1  ;;  %p884_p10 = scmp.lt.s32.totalorder %s875_s1, %s875_s1 }
  0x6b   : > { %p878_p11 = pnand %p876_p13, %p864_p6  ;;  %p885_p7 = por %p884_p10, %p883_p5 }
  0x6d   : > { %p879_p0 = pneg %p878_p11 }
  0x6f   : > { %p886_p9 = pnand %p885_p7, %p879_p0 }
  0x71   : > { %889 = shalt.err (!%p886_p9)
}
  0x72   : > { %730 = dma.hbm_to_vmem [thread:$0]  (!%p1507_p3), %s1470_s3, 2560, %s1178_s30, [#allocation9], %s1506_s7, %s1506_s7, %s1505_s21  }
  0x73   : > { %s712_s20 = sshll.u32 %s1006_s19, 8  ;;  %s258_s29 = scalar_lea.vmem [#allocation7], %s695_s27 }
  0x74   : > { %s1255_s14 = scalar_lea.hbm %s1469_s2, %s712_s20  ;;  %s268_s25 = sshll.u32 %s258_s29, 4  ;;  %s269_s25 = int_to_ptr.vmem [resolvable:$true] %s268_s25 }
  0x75   : > { %s890_s10 = scalar_lea.hbm %s1255_s14, 256  ;;  %p1508_p9 = scmp.ne.s32.totalorder %s1497_s11, 0 }
  0x76   : > { %p891_p7 = scmp.ne.s32.totalorder %s1255_s14, %s890_s10  ;;  %s895_s21 = scalar_lea.hbm %s1469_s2, 512 }
  0x77   : > { %p896_p3 = scmp.lt.u32.totalorder %s1255_s14, %s1469_s2  ;;  %p897_p8 = scmp.lt.u32.totalorder %s895_s21, %s890_s10 }
  0x78   : > { %p893_p4 = pnand %p891_p7, %p1508_p9  ;;  %p899_p1 = scmp.lt.u32.totalorder %s890_s10, %s1255_s14 }
  0x79   : > { %p898_p12 = por %p897_p8, %p896_p3 }
  0x7a   : > { %p894_p6 = pneg %p893_p4 }
  0x7b   : > { %p900_p2 = por %p899_p1, %p898_p12 }
  0x7d   : > { %p901_p13 = pnand %p900_p2, %p894_p6 }
  0x7f   : > { %904 = shalt.err (!%p901_p13)
}
  0x80   : > { %s905_s27 = scalar_lea.vmem %s269_s25, 256  ;;  %s1017_s1 = smov [#allocation7]  }
  0x81   : > { %p906_p11 = scmp.ne.s32.totalorder %s269_s25, %s905_s27  ;;  %s910_s0 = sshll.u32 %s1017_s1, 4  ;;  %s911_s0 = int_to_ptr.vmem [resolvable:$false] %s910_s0 }
  0x82   : > { %s912_s17 = scalar_lea.vmem %s911_s0, 512  ;;  %p913_p10 = scmp.lt.s32.totalorder %s269_s25, %s911_s0 }
  0x83   : > { %p908_p0 = pnand %p906_p11, %p1508_p9  ;;  %p914_p7 = scmp.lt.s32.totalorder %s912_s17, %s905_s27 }
  0x85   : > { %p909_p5 = pneg %p908_p0  ;;  %p915_p4 = por %p914_p7, %p913_p10 }
  0x87   : > { %p916_p3 = pnand %p915_p4, %p909_p5 }
  0x89   : > { %919 = shalt.err (!%p916_p3)
}
  0x8a   : > { %p1509_p8 = scmp.ne.s32.totalorder %s1495_s28, 0  ;;  %p1510_p6 = scmp.ne.s32.totalorder %s1502_s23, 0 }
  0x8b   : > { %s1278_s11 = sand.u32 (!%p1510_p6), 1, %s994_s16   ;;  %p1511_p9 = scmp.ne.s32.totalorder (!%p1510_p6), %s1498_s22, 0 }
  0x8c   : > { %740 = dma.hbm_to_vmem [thread:$0]  (!%p1509_p8), %s1255_s14, 256, %s269_s25, %s1114_s9  }
  0x8d   : > { %277 = sbr.rel (%p1510_p6) target bundleno = 327 (0x147), region = 36  ;;  %s699_s20 = sshll.u32 (!%p1510_p6), %s1278_s11, 5 }
  0x8e   : > { %s280_s24 = scalar_lea.sflag (!%p1510_p6), [#allocation3], %s1278_s11  ;;  %s283_s12 = scalar_lea.vmem (!%p1510_p6), [#allocation2], %s699_s20 }
  0x94   : > { %973 = dma.done.wait (%p1511_p9), %s280_s24, 512  }
  0x95   : > { %975 = vsyncadd (%p1511_p9), %s280_s24, 4294966784  ;;  %s288_s28 = sand.u32 1, %s1148_s13   ;;  %s292_s23 = scalar_lea.vmem [#allocation5], %s699_s20 }
  0x96   : > { %s289_s9 = scalar_lea.sflag [#allocation6], %s288_s28 }
  0x97   : > { %977 = dma.done.wait (%p1511_p9), %s289_s9, 768  }
  0x98   : > { %979 = vsyncadd (%p1511_p9), %s289_s9, 4294966528  ;;  %s701_s14 = sshll.u32 %s1278_s11, 4  ;;  %p1512_p12 = scmp.eq.s32.totalorder %s1148_s13, 0 }
  0x99   : > { %s301_s29 = scalar_lea.vmem [#allocation7], %s701_s14 }
  0x9a   : > { %981 = dma.done.wait (%p1512_p12), [#allocation9], 2560   ;;  %p1513_p1 = pmov %p1512_p12 }
  0x9b   : > { %v369_v0 = vld [vmem:[%s283_s12] sm:$0xff]  ;;  %s1018_s25 = smov 1   ;;  %s1019_s10 = smov 127   ;;  %v370_v1 = vld [vmem:[%s283_s12 + $0x8] sm:$0xff]  ;;  %v704_v2 = vld [vmem:[%s283_s12 + $0x18] sm:$0xff]  ;;  %v340_v10 = vlaneseq }
  0x9c   : > { %983 = vsyncadd (%p1513_p1), [#allocation9], 4294964736  ;;  %393 = vrot.lane.b32.xlu1 %v369_v0, %s1018_s25  ;;  %386 = vrot.lane.b32.xlu0 %v369_v0, %s1019_s10  ;;  %v703_v3 = vld [vmem:[%s283_s12 + $0x10] sm:$0xff]  ;;  %v1296_v4 = vld [vmem:[%s292_s23 + $0x8] sm:$0xff]  ;;  %s713_s13 = smul.u32 80, %s1278_s11  ;;  %p1518_p13 = scmp.ne.s32.totalorder %s1500_s6, 0 }
  0x9d   : > { %v1298_v5 = vld [vmem:[%s292_s23] sm:$0xff]  ;;  %v1304_v6 = vld [vmem:[%s292_s23 + $0x18] sm:$0xff]  ;;  %v1306_v7 = vld [vmem:[%s292_s23 + $0x10] sm:$0xff]  ;;  %v1320_v11 = vand.u32 127, %v340_v10  ;;  %s714_s5 = smul.u32 1280, %s1002_s18  ;;  %s523_s18 = scalar_lea.sflag [#allocation4], %s1278_s11 }
  0x9e   : > { %v1312_v8 = vld [vmem:[%s301_s29 + $0x8] sm:$0xff]  ;;  %v1314_v9 = vld [vmem:[%s301_s29] sm:$0xff]  ;;  %s1347_s22 = scalar_lea.vmem [#allocation10], %s713_s13  ;;  %s1020_s1 = smov [#allocation10]  }
  0x9f   : > { %v342_v12 = vadd.s32 128, %v1320_v11  ;;  %v347_v13 = vand.u32 1, %v1320_v11  ;;  %v381_v17 = vld [vmem:[#allocation8] sm:$0xff]  ;;  %v382_v18 = vld [vmem:[#allocation8 + $0x8] sm:$0xff]  ;;  %vm397_vm0 = vcmp.lt.s32.totalorder %v1320_v11, 1  ;;  %vm390_vm1 = vcmp.lt.s32.totalorder %v1320_v11, 127  ;;  %s1416_s26 = scalar_lea.hbm %s1471_s4, %s714_s5 }
  0xa0   : > { %395 = vrot.lane.b32.xlu1 %v370_v1, %s1018_s25  ;;  %388 = vrot.lane.b32.xlu0 %v370_v1, %s1019_s10  ;;  %v402_v21 = vmul.f32 %v381_v17, %v369_v0  ;;  %v403_v22 = vmul.f32 %v382_v18, %v370_v1  ;;  %v384_v24 = vld [vmem:[#allocation8 + $0x50] sm:$0xff]  ;;  %v385_v25 = vld [vmem:[#allocation8 + $0x58] sm:$0xff]  ;;  %v414_v44 = vld [vmem:[#allocation8 + $0x60] sm:$0xff]  ;;  %s539_s30 = sshll.u32 %s1347_s22, 4  ;;  %s924_s0 = sshll.u32 %s1020_s1, 4  ;;  %s1418_s30 = int_to_ptr.vmem [resolvable:$true] %s539_s30  ;;  %s925_s0 = int_to_ptr.vmem [resolvable:$false] %s924_s0 }
  0xa1   : > { %v354_v14 = vand.u32 1, %v342_v12  ;;  %vm1326_vm2 = vcmp.eq.s32.totalorder %v347_v13, 0  ;;  %v412_v37 = vld [vmem:[#allocation8 + $0x18] sm:$0xff]  ;;  %v411_v38 = vld [vmem:[#allocation8 + $0x10] sm:$0xff]  ;;  %v415_v45 = vld [vmem:[#allocation8 + $0x68] sm:$0xff]  ;;  %s920_s27 = scalar_lea.vmem %s1418_s30, 1280  ;;  %p927_p5 = scmp.lt.s32.totalorder %s1418_s30, %s925_s0 }
  0xa2   : > { %v431_v41 = vmul.f32 %v704_v2, %v412_v37  ;;  %v430_v42 = vmul.f32 %v703_v3, %v411_v38  ;;  %v440_v57 = vld [vmem:[#allocation8 + $0x28] sm:$0xff]  ;;  %v439_v58 = vld [vmem:[#allocation8 + $0x20] sm:$0xff]  ;;  %v442_v0 = vld [vmem:[#allocation8 + $0x70] sm:$0xff]  ;;  %p921_p2 = scmp.ne.s32.totalorder %s1418_s30, %s920_s27  ;;  %s926_s17 = scalar_lea.vmem %s925_s0, 2560 }
  0xa3   : > { %vm1330_vm3 = vcmp.eq.s32.totalorder %v354_v14, 0  ;;  %v459_v61 = vmul.f32 %v440_v57, %v1296_v4  ;;  %v458_v62 = vmul.f32 %v439_v58, %v1298_v5  ;;  %v443_v1 = vld [vmem:[#allocation8 + $0x78] sm:$0xff]  ;;  %v496_v38 = vld [vmem:[#allocation8 + $0x48] sm:$0xff]  ;;  %p928_p10 = scmp.lt.s32.totalorder %s926_s17, %s920_s27 }
  0xa4   : > { %418 = vrot.lane.b32.xlu1 %v704_v2, %s1019_s10  ;;  %416 = vrot.lane.b32.xlu0 %v703_v3, %s1019_s10  ;;  %v468_v18 = vld [vmem:[#allocation8 + $0x38] sm:$0xff]  ;;  %p922_p11 = pnand %p921_p2, %p1518_p13 }
  0xa5   : > { %p929_p7 = por %p928_p10, %p927_p5 }
  0xa6   : > { %p923_p0 = pneg %p922_p11 }
  0xa8   : > { %424 = vrot.lane.b32.xlu1 %v704_v2, %s1018_s25  ;;  %422 = vrot.lane.b32.xlu0 %v703_v3, %s1018_s25  ;;  %p930_p4 = pnand %p929_p7, %p923_p0 }
  0xac   : > { %446 = vrot.lane.b32.xlu1 %v1296_v4, %s1019_s10  ;;  %444 = vrot.lane.b32.xlu0 %v1298_v5, %s1019_s10 }
  0xb0   : > { %452 = vrot.lane.b32.xlu1 %v1296_v4, %s1018_s25  ;;  %450 = vrot.lane.b32.xlu0 %v1298_v5, %s1018_s25 }
  0xb4   : > { %474 = vrot.lane.b32.xlu1 %v1304_v6, %s1019_s10  ;;  %472 = vrot.lane.b32.xlu0 %v1306_v7, %s1019_s10 }
  0xb8   : > { %480 = vrot.lane.b32.xlu1 %v1304_v6, %s1018_s25  ;;  %478 = vrot.lane.b32.xlu0 %v1306_v7, %s1018_s25 }
  0xbc   : > { %502 = vrot.lane.b32.xlu1 %v1312_v8, %s1019_s10  ;;  %500 = vrot.lane.b32.xlu0 %v1314_v9, %s1019_s10 }
  0xc0   : > { %508 = vrot.lane.b32.xlu1 %v1312_v8, %s1018_s25  ;;  %506 = vrot.lane.b32.xlu0 %v1314_v9, %s1018_s25 }
 0x10e   : > { %v394_v15 = vpop.permute.xlu1 %393  ;;  %v387_v16 = vpop.permute.xlu0 %386 }
 0x112   : > { %v396_v23 = vpop.permute.xlu1 %395  ;;  %v389_v26 = vpop.permute.xlu0 %388 }
 0x113   : > { %v398_v27 = vsel %vm397_vm0, %v394_v15, %v396_v23  ;;  %v399_v28 = vsel %vm397_vm0, %v396_v23, %v394_v15  ;;  %v391_v29 = vsel %vm390_vm1, %v387_v16, %v389_v26  ;;  %v392_v30 = vsel %vm390_vm1, %v389_v26, %v387_v16 }
 0x114   : > { %v400_v31 = vsel %vm1326_vm2, %v391_v29, %v399_v28  ;;  %v401_v32 = vsel %vm1330_vm3, %v392_v30, %v398_v27  ;;  %v470_v27 = vld [vmem:[#allocation8 + $0x80] sm:$0xff]  ;;  %v471_v28 = vld [vmem:[#allocation8 + $0x88] sm:$0xff] }
 0x115   : > { %v404_v33 = vmul.f32 %v400_v31, %v384_v24  ;;  %v405_v34 = vmul.f32 %v401_v32, %v385_v25  ;;  %v487_v24 = vmul.f32 %v1304_v6, %v468_v18 }
 0x116   : > { %v419_v35 = vpop.permute.xlu1 %418  ;;  %v417_v36 = vpop.permute.xlu0 %416 }
 0x117   : > { %v406_v39 = vadd.f32 %v404_v33, %v402_v21  ;;  %v407_v40 = vadd.f32 %v405_v34, %v403_v22  ;;  %v420_v47 = vsel %vm390_vm1, %v417_v36, %v419_v35  ;;  %v421_v48 = vsel %vm390_vm1, %v419_v35, %v417_v36  ;;  %v467_v21 = vld [vmem:[#allocation8 + $0x30] sm:$0xff] }
 0x118   : > { %v486_v25 = vmul.f32 %v1306_v7, %v467_v21 }
 0x119   : > { %408 = vst [vmem:[%s1347_s22] sm:$0xff] %v406_v39  ;;  %409 = vst [vmem:[%s1347_s22 + $0x8] sm:$0xff] %v407_v40  ;;  %v495_v39 = vld [vmem:[#allocation8 + $0x40] sm:$0xff] }
 0x11a   : > { %v425_v43 = vpop.permute.xlu1 %424  ;;  %v423_v46 = vpop.permute.xlu0 %422 }
 0x11b   : > { %v426_v49 = vsel %vm397_vm0, %v423_v46, %v425_v43  ;;  %v427_v50 = vsel %vm397_vm0, %v425_v43, %v423_v46  ;;  %v514_v43 = vmul.f32 %v495_v39, %v1314_v9  ;;  %v499_v46 = vld [vmem:[#allocation8 + $0x98] sm:$0xff] }
 0x11c   : > { %v428_v51 = vsel %vm1326_vm2, %v420_v47, %v427_v50  ;;  %v429_v52 = vsel %vm1330_vm3, %v421_v48, %v426_v49 }
 0x11d   : > { %v432_v53 = vmul.f32 %v428_v51, %v414_v44  ;;  %v433_v54 = vmul.f32 %v429_v52, %v415_v45  ;;  %v498_v45 = vld [vmem:[#allocation8 + $0x90] sm:$0xff] }
 0x11e   : > { %v447_v55 = vpop.permute.xlu1 %446  ;;  %v445_v56 = vpop.permute.xlu0 %444 }
 0x11f   : > { %v434_v59 = vadd.f32 %v432_v53, %v430_v42  ;;  %v435_v60 = vadd.f32 %v433_v54, %v431_v41  ;;  %v448_v3 = vsel %vm390_vm1, %v445_v56, %v447_v55  ;;  %v449_v10 = vsel %vm390_vm1, %v447_v55, %v445_v56 }
 0x120   : > { %v515_v42 = vmul.f32 %v496_v38, %v1312_v8 }
 0x121   : > { %436 = vst [vmem:[%s1347_s22 + $0x10] sm:$0xff] %v434_v59  ;;  %437 = vst [vmem:[%s1347_s22 + $0x18] sm:$0xff] %v435_v60 }
 0x122   : > { %v453_v63 = vpop.permute.xlu1 %452  ;;  %v451_v2 = vpop.permute.xlu0 %450 }
 0x123   : > { %v454_v12 = vsel %vm397_vm0, %v451_v2, %v453_v63  ;;  %v455_v4 = vsel %vm397_vm0, %v453_v63, %v451_v2 }
 0x124   : > { %v456_v5 = vsel %vm1326_vm2, %v448_v3, %v455_v4  ;;  %v457_v13 = vsel %vm1330_vm3, %v449_v10, %v454_v12 }
 0x125   : > { %v460_v14 = vmul.f32 %v456_v5, %v442_v0  ;;  %v461_v15 = vmul.f32 %v457_v13, %v443_v1 }
 0x126   : > { %v475_v16 = vpop.permute.xlu1 %474  ;;  %v473_v17 = vpop.permute.xlu0 %472 }
 0x127   : > { %v462_v22 = vadd.f32 %v460_v14, %v458_v62  ;;  %v463_v23 = vadd.f32 %v461_v15, %v459_v61  ;;  %v476_v30 = vsel %vm390_vm1, %v473_v17, %v475_v16  ;;  %v477_v31 = vsel %vm390_vm1, %v475_v16, %v473_v17 }
 0x129   : > { %464 = vst [vmem:[%s1347_s22 + $0x20] sm:$0xff] %v462_v22  ;;  %465 = vst [vmem:[%s1347_s22 + $0x28] sm:$0xff] %v463_v23 }
 0x12a   : > { %v481_v26 = vpop.permute.xlu1 %480  ;;  %v479_v29 = vpop.permute.xlu0 %478 }
 0x12b   : > { %v482_v32 = vsel %vm397_vm0, %v479_v29, %v481_v26  ;;  %v483_v6 = vsel %vm397_vm0, %v481_v26, %v479_v29 }
 0x12c   : > { %v484_v7 = vsel %vm1326_vm2, %v476_v30, %v483_v6  ;;  %v485_v33 = vsel %vm1330_vm3, %v477_v31, %v482_v32 }
 0x12d   : > { %v488_v34 = vmul.f32 %v484_v7, %v470_v27  ;;  %v489_v35 = vmul.f32 %v485_v33, %v471_v28 }
 0x12e   : > { %v503_v36 = vpop.permute.xlu1 %502  ;;  %v501_v37 = vpop.permute.xlu0 %500 }
 0x12f   : > { %v490_v40 = vadd.f32 %v488_v34, %v486_v25  ;;  %v491_v41 = vadd.f32 %v489_v35, %v487_v24  ;;  %v504_v48 = vsel %vm390_vm1, %v501_v37, %v503_v36  ;;  %v505_v49 = vsel %vm390_vm1, %v503_v36, %v501_v37 }
 0x131   : > { %492 = vst [vmem:[%s1347_s22 + $0x30] sm:$0xff] %v490_v40  ;;  %493 = vst [vmem:[%s1347_s22 + $0x38] sm:$0xff] %v491_v41 }
 0x132   : > { %v509_v44 = vpop.permute.xlu1 %508  ;;  %v507_v47 = vpop.permute.xlu0 %506 }
 0x133   : > { %v510_v50 = vsel %vm397_vm0, %v507_v47, %v509_v44  ;;  %v511_v8 = vsel %vm397_vm0, %v509_v44, %v507_v47 }
 0x134   : > { %v512_v9 = vsel %vm1326_vm2, %v504_v48, %v511_v8  ;;  %v513_v51 = vsel %vm1330_vm3, %v505_v49, %v510_v50 }
 0x135   : > { %v516_v52 = vmul.f32 %v512_v9, %v498_v45  ;;  %v517_v53 = vmul.f32 %v513_v51, %v499_v46 }
 0x137   : > { %v518_v54 = vadd.f32 %v516_v52, %v514_v43  ;;  %v519_v55 = vadd.f32 %v517_v53, %v515_v42 }
 0x139   : > { %520 = vst [vmem:[%s1347_s22 + $0x40] sm:$0xff] %v518_v54  ;;  %521 = vst [vmem:[%s1347_s22 + $0x48] sm:$0xff] %v519_v55 }
 0x13a   : > { %933 = shalt.err (!%p930_p4)
}
 0x13b   : > { %s934_s11 = scalar_lea.hbm %s1416_s26, 1280  ;;  %s938_s12 = scalar_lea.hbm %s1471_s4, 2560 }
 0x13c   : > { %p935_p3 = scmp.ne.s32.totalorder %s1416_s26, %s934_s11  ;;  %p939_p9 = scmp.lt.u32.totalorder %s1416_s26, %s1471_s4 }
 0x13d   : > { %p940_p12 = scmp.lt.u32.totalorder %s938_s12, %s934_s11  ;;  %p942_p2 = scmp.lt.u32.totalorder %s934_s11, %s1416_s26 }
 0x13e   : > { %p936_p8 = pnand %p935_p3, %p1518_p13 }
 0x13f   : > { %p941_p1 = por %p940_p12, %p939_p9 }
 0x140   : > { %p937_p6 = pneg %p936_p8 }
 0x141   : > { %p943_p11 = por %p942_p2, %p941_p1 }
 0x143   : > { %p944_p0 = pnand %p943_p11, %p937_p6 }
 0x145   : > { %947 = shalt.err (!%p944_p0)
}
 0x146   : > { %725 = dma.vmem_to_hbm [thread:$0]  (%p1518_p13), %s1418_s30, 1280, %s1416_s26, %s523_s18  }
 0x147 PF: > { %s1519_s23 = sld [smem:[#allocation16_spill]]  ;;  %s551_s14 = sand.u32 1, %s990_s15  }
 0x148   : > { %p1520_p5 = scmp.ne.s32.totalorder %s1501_s8, 0  ;;  %s552_s29 = scalar_lea.sflag [#allocation4], %s551_s14 }
 0x14d   : > { %p1521_p10 = scmp.ge.s32.totalorder %s1519_s23, 2 }
 0x14f   : > { %p742_p7 = pnand %p1521_p10, %p1520_p5 }
 0x151   : > { %985 = dma.done.wait (!%p742_p7), %s552_s29, 1280  }
 0x152   : > { %987 = vsyncadd (!%p742_p7), %s552_s29, 4294966016  ;;  %s24_s20 = sadd.s32 1, %s1519_s23   ;;  %s1522_s25 = sld [smem:[#allocation15_spill]] }
 0x153   : > { %p21_p4 = scmp.ge.s32.totalorder %s24_s20, 4   ;;  %s1523_s17 = sld [smem:[#allocation18_spill]] }
 0x154   : > { %s1524_s6 = sld [smem:[#allocation17_spill]]  ;;  %s1525_s15 = smov %s994_s16 }
 0x155   : > { %s1527_s18 = smov %s1006_s19  ;;  %23 = sbr.rel (!%p21_p4) target bundleno = 12 (0xc), region = 121 }
 0x158   : > { %s1526_s16 = smov %s1522_s25 }
 0x15a   : > { %s1528_s19 = smov %s1524_s6 }
 0x15c   :  { %557 = vsyncpa [#allocation3], 1 }
 0x15d   :  { %559 = vsyncpa [#allocation3 + $0x1], 1 }
 0x15e   :  { %560 = vsyncpa [#allocation6], 1 }
 0x15f   :  { %562 = vsyncpa [#allocation6 + $0x1], 1 }
 0x160   :  { %563 = vsyncpa [#allocation9], 1 }
 0x161   :  { %564 = vsyncpa [#allocation4], 1 }
 0x162   :  { %566 = vsyncpa [#allocation4 + $0x1], 1 }

</bundles_post_ra>
